<compile_context>
chip_gen: v7x
topology: tpu7x:2x2x1
jax: 0.10.0
libtpu: 0.0.40
codegen_flags: <defaults>
</compile_context>

<pallas_src>
import jax
import jax.numpy as jnp
from jax import lax
from jax.experimental import pallas as pl
from jax.experimental.pallas import tpu as pltpu


# ------------------------------ fused kernel ------------------------------

def _make_ck_kernel(n_enc, n_dec, k_steps, t_tile):
    """Fused encoder -> Koopman (fwd/bwd, all k steps) -> decoder kernel.

    Ref order per grid point (m, b, t):
      inputs : x (Tt, S), dynT (k, D, D), bdynT (k, D, D), enc_w..., dec_w...
      outputs: fwd (k, Tt, S), bwd (k, Tt, S), rec (Tt, S)
    """

    def _mlp(h, w_refs):
        n = len(w_refs)
        for i, w_ref in enumerate(w_refs):
            h = jnp.dot(h, w_ref[...], preferred_element_type=jnp.float32)
            if i < n - 1:
                h = jnp.maximum(h, 0.0)   # ReLU between layers, none at the end
        return h

    def kernel(*refs):
        x_ref, dynT_ref, bdynT_ref = refs[0], refs[1], refs[2]
        enc_refs = refs[3:3 + n_enc]
        dec_refs = refs[3 + n_enc:3 + n_enc + n_dec]
        fwd_ref, bwd_ref, rec_ref = refs[3 + n_enc + n_dec:]

        # Encode this (m, b, time-tile) slab once; z never leaves VMEM.
        z = _mlp(x_ref[...], enc_refs)                              # (Tt, D)

        # reconstruction = decoder(z_fwd)
        rec_ref[...] = _mlp(z, dec_refs).astype(rec_ref.dtype)

        # Backward path: encoder(x.flip(T)) == encoder(x).flip(T) (row-wise MLP),
        # so only z needs reversing.  Within-tile reversal via anti-identity
        # matmul on the MXU (robustly lowerable, exact); the across-tile half of
        # the flip is handled by the mirrored output block index.
        rr = lax.broadcasted_iota(jnp.int32, (t_tile, t_tile), 0)
        cc = lax.broadcasted_iota(jnp.int32, (t_tile, t_tile), 1)
        rev = jnp.where(rr + cc == t_tile - 1, 1.0, 0.0).astype(jnp.float32)
        z_rev = jnp.dot(rev, z, preferred_element_type=jnp.float32)  # (Tt, D)

        for j in range(k_steps):                                     # static unroll
            q_f = jnp.dot(z, dynT_ref[j], preferred_element_type=jnp.float32)
            fwd_ref[j] = _mlp(q_f, dec_refs).astype(fwd_ref.dtype)
            q_b = jnp.dot(z_rev, bdynT_ref[j], preferred_element_type=jnp.float32)
            bwd_ref[j] = _mlp(q_b, dec_refs).astype(bwd_ref.dtype)

    return kernel


def _pick_time_tile(T, max_width, *, budget_bytes=4 << 20, override=None):
    """Largest time tile that (a) divides T, (b) is a multiple of 8 or == T,
    and (c) keeps a rough activation footprint under the VMEM budget."""
    if override is not None:
        if T % override or not (override % 8 == 0 or override == T):
            raise ValueError("time_tile must divide T and be a multiple of 8 or == T")
        return override
    per_row = 4 * 6 * max(max_width, 1)        # ~a few live f32 buffers / row
    cap = max(1, budget_bytes // per_row)
    if T <= cap:
        return T                               # whole time extent in one block
    best = None
    for d in range(8, min(cap, T) + 1, 8):     # multiples of 8 dividing T
        if T % d == 0:
            best = d
    return best if best is not None else T


# ----------------------------- CK forward (glue) -----------------------------

def ck_forward(x, params, *, time_tile=None):
    """Forward pass of CK with simple_dynamics=True semantics (single fused kernel)."""
    B, M, T, S = x.shape
    enc_w = list(params["encoder"])
    dec_w = list(params["decoder"])
    dyn = params["dynamics"]        # (k, M, D, D)
    bdyn = params["backdynamics"]   # (k, M, D, D)
    k_steps, _, D, _ = dyn.shape

    # Tiny pre-transpose (k*M*D*D elems) so the kernel does z @ K^T directly.
    dynT = jnp.swapaxes(dyn, -1, -2)
    bdynT = jnp.swapaxes(bdyn, -1, -2)

    widths = ([w.shape[0] for w in enc_w + dec_w]
              + [w.shape[1] for w in enc_w + dec_w])
    t_tile = _pick_time_tile(T, max(widths), override=time_tile)
    n_t = T // t_tile

    # m slowest so the per-m Koopman block stays VMEM-resident across (b, t);
    # MLP weights have a constant index_map so they are DMA'd only once.
    grid = (M, B, n_t)

    x_spec = pl.BlockSpec((None, None, t_tile, S), lambda m, b, t: (b, m, t, 0))
    koop_spec = pl.BlockSpec((k_steps, None, D, D), lambda m, b, t: (0, m, 0, 0))
    w_specs = [pl.BlockSpec(tuple(w.shape), lambda m, b, t: (0, 0))
               for w in enc_w + dec_w]

    fwd_spec = pl.BlockSpec((None, None, k_steps, t_tile, S),
                            lambda m, b, t: (b, m, 0, t, 0))
    # Across-tile half of the time flip: mirrored time-block index.
    bwd_spec = pl.BlockSpec((None, None, k_steps, t_tile, S),
                            lambda m, b, t: (b, m, 0, n_t - 1 - t, 0))
    rec_spec = pl.BlockSpec((None, None, t_tile, S), lambda m, b, t: (b, m, t, 0))

    out_shape = (
        jax.ShapeDtypeStruct((B, M, k_steps, T, S), x.dtype),   # fwd predictions
        jax.ShapeDtypeStruct((B, M, k_steps, T, S), x.dtype),   # bwd predictions
        jax.ShapeDtypeStruct((B, M, T, S), x.dtype),            # reconstruction
    )

    kernel = _make_ck_kernel(len(enc_w), len(dec_w), k_steps, t_tile)

    fwd5, bwd5, rec = pl.pallas_call(
        kernel,
        out_shape=out_shape,
        grid_spec=pltpu.PrefetchScalarGridSpec(
            num_scalar_prefetch=0,
            grid=grid,
            in_specs=[x_spec, koop_spec, koop_spec] + w_specs,
            out_specs=[fwd_spec, bwd_spec, rec_spec],
        ),
        compiler_params=pltpu.CompilerParams(
            dimension_semantics=("parallel", "parallel", "parallel")),
    )(x, dynT, bdynT, *enc_w, *dec_w)

    # (B, M, k, T, S) -> (B, M, k*T, S): contiguous merge, no data movement.
    fwd_pred = fwd5.reshape(B, M, k_steps * T, S)
    bwd_pred = bwd5.reshape(B, M, k_steps * T, S)
    if k_steps > 1:
        bwd_pred = bwd_pred[..., :T, :]

    return {
        "predictions": fwd_pred,                 # MODELS_TENSOR_PREDICITONS_KEY
        "other": {                               # OTHER_KEY
            "D": dyn,
            "C": bdyn,
            "reconstruction": rec,
            "backward_pred": bwd_pred,
            "dynamics": dyn,
        },
    }


# ----------------------------- parameter init -----------------------------

def fc_dims(input_dim, output_dim, n_layers, l0_units, units_factor):
    dims = [input_dim]
    units = float(l0_units)
    for _ in range(n_layers - 1):
        dims.append(int(units))
        units *= units_factor
    dims.append(output_dim)
    return dims


def init_params(key, states_dim, observable_dim, m_dynamics, n_layers,
                l0_units, units_factor, k_prediction_steps):
    enc_dims = fc_dims(states_dim, observable_dim, n_layers, l0_units, units_factor)
    dec_l0 = int(l0_units * units_factor ** (n_layers - 1))
    dec_dims = fc_dims(observable_dim, states_dim, n_layers, dec_l0, 1.0 / units_factor)
    keys = jax.random.split(key, 2 * n_layers + 2)

    def make_w(k, fan_in, fan_out):
        return (jax.random.normal(k, (fan_in, fan_out), jnp.float32)
                * (1.0 / jnp.sqrt(fan_in)))

    enc_w = [make_w(keys[i], enc_dims[i], enc_dims[i + 1]) for i in range(n_layers)]
    dec_w = [make_w(keys[n_layers + i], dec_dims[i], dec_dims[i + 1])
             for i in range(n_layers)]

    D = observable_dim
    xav = jnp.sqrt(2.0 / (D + D))  # xavier_normal_ std for square (D, D)
    dyn = jax.random.normal(keys[-2], (k_prediction_steps, m_dynamics, D, D),
                            jnp.float32) * xav
    bdyn = jax.random.normal(keys[-1], (k_prediction_steps, m_dynamics, D, D),
                             jnp.float32) * xav
    return {"encoder": enc_w, "decoder": dec_w, "dynamics": dyn, "backdynamics": bdyn}


# ----------------------------- pure-JAX reference -----------------------------

def _mlp_ref(x2d, weights):
    h = x2d
    for i, w in enumerate(weights):
        h = jnp.dot(h, w, precision=jax.lax.Precision.HIGHEST)
        if i < len(weights) - 1:
            h = jnp.maximum(h, 0.0)
    return h


def ck_forward_ref(x, params):
    """Literal transcription of the PyTorch forward (simple_dynamics=True)."""
    B, M, T, S = x.shape
    enc_w, dec_w = params["encoder"], params["decoder"]
    dyn, bdyn = params["dynamics"], params["backdynamics"]
    k_steps = dyn.shape[0]

    def enc(xx):
        b, m, t, s = xx.shape
        return _mlp_ref(xx.reshape(b * m * t, s), enc_w).reshape(b, m, t, -1)

    def dec(zz):
        b, m, t, d = zz.shape
        return _mlp_ref(zz.reshape(b * m * t, d), dec_w).reshape(b, m, t, -1)

    z_fwd = enc(x)
    z_bwd = enc(jnp.flip(x, axis=2))   # x.flip(dims=(2,))
    koop = lambda z, K: jnp.einsum("bmtd,med->bmte", z, K,
                                   precision=jax.lax.Precision.HIGHEST)
    q_fwd = jnp.concatenate([koop(z_fwd, dyn[j]) for j in range(k_steps)], axis=2)
    q_bwd = jnp.concatenate([koop(z_bwd, bdyn[j]) for j in range(k_steps)], axis=2)
    fwd = dec(q_fwd)
    bwd = dec(q_bwd)
    if k_steps > 1:
        bwd = bwd[..., :T, :]
    return fwd, bwd, dec(z_fwd)


# ----------------------------- main -----------------------------

def _check(name, got, want, rtol=1e-3, atol=1e-3):
    err = float(jnp.max(jnp.abs(got - want)))
    assert jnp.allclose(got, want, rtol=rtol, atol=atol), (
        f"{name} mismatch (max abs err {err:.3e})")


if __name__ == "__main__":
    key = jax.random.PRNGKey(0)
    pkey, xkey, pkey2, xkey2 = jax.random.split(key, 4)

    # --- config 1: small shapes consistent with the module ---
    B, M, T = 2, 2, 8
    states_dim, observable_dim = 16, 8
    n_layers, l0_units, units_factor = 3, 32, 0.5
    k_steps = 1

    params = init_params(pkey, states_dim, observable_dim, M, n_layers,
                         l0_units, units_factor, k_steps)
    x = jax.random.normal(xkey, (B, M, T, states_dim), jnp.float32)

    out = jax.block_until_ready(ck_forward(x, params))

    assert out["predictions"].shape == (B, M, k_steps * T, states_dim)
    assert out["other"]["reconstruction"].shape == (B, M, T, states_dim)
    assert out["other"]["backward_pred"].shape == (B, M, T, states_dim)

    ref_fwd, ref_bwd, ref_rec = ck_forward_ref(x, params)
    _check("predictions", out["predictions"], ref_fwd)
    _check("backward_pred", out["other"]["backward_pred"], ref_bwd)
    _check("reconstruction", out["other"]["reconstruction"], ref_rec)

    # --- config 2: k_prediction_steps=2 and multiple time blocks, exercising
    #     the mirrored-block bwd index_map and the in-tile reversal together ---
    B2, M2, T2, k2 = 2, 1, 16, 2
    params2 = init_params(pkey2, states_dim, observable_dim, M2, n_layers,
                          l0_units, units_factor, k2)
    x2 = jax.random.normal(xkey2, (B2, M2, T2, states_dim), jnp.float32)
    out2 = jax.block_until_ready(ck_forward(x2, params2, time_tile=8))

    assert out2["predictions"].shape == (B2, M2, k2 * T2, states_dim)
    assert out2["other"]["backward_pred"].shape == (B2, M2, T2, states_dim)
    assert out2["other"]["reconstruction"].shape == (B2, M2, T2, states_dim)

    ref_fwd2, ref_bwd2, ref_rec2 = ck_forward_ref(x2, params2)
    _check("predictions(k=2)", out2["predictions"], ref_fwd2)
    _check("backward_pred(k=2)", out2["other"]["backward_pred"], ref_bwd2)
    _check("reconstruction(k=2)", out2["other"]["reconstruction"], ref_rec2)

    print("KERNEL_OK")
</pallas_src>

<mosaic_0001>
module attributes {stable_mosaic.version = 11 : i64} {
  func.func @kernel(%arg0: i32, %arg1: i32, %arg2: i32, %arg3: memref<1x1x8x16xf32, #tpu.memory_space<vmem>>, %arg4: memref<1x1x8x8xf32, #tpu.memory_space<vmem>>, %arg5: memref<1x1x8x8xf32, #tpu.memory_space<vmem>>, %arg6: memref<16x32xf32, #tpu.memory_space<vmem>>, %arg7: memref<32x16xf32, #tpu.memory_space<vmem>>, %arg8: memref<16x8xf32, #tpu.memory_space<vmem>>, %arg9: memref<8x8xf32, #tpu.memory_space<vmem>>, %arg10: memref<8x16xf32, #tpu.memory_space<vmem>>, %arg11: memref<16x16xf32, #tpu.memory_space<vmem>>, %arg12: memref<1x1x1x8x16xf32, #tpu.memory_space<vmem>>, %arg13: memref<1x1x1x8x16xf32, #tpu.memory_space<vmem>>, %arg14: memref<1x1x8x16xf32, #tpu.memory_space<vmem>>) attributes {dimension_semantics = [#tpu.dimension_semantics<parallel>, #tpu.dimension_semantics<parallel>, #tpu.dimension_semantics<parallel>], iteration_bounds = array<i64: 2, 2, 1>, scalar_prefetch = 0 : i64, scratch_operands = 0 : i64, tpu.core_type = #tpu.core_type<tc>, window_params = [{transform_indices = @transform_0, window_bounds = array<i64: 1, 1, 8, 16>}, {transform_indices = @transform_1, window_bounds = array<i64: 1, 1, 8, 8>}, {transform_indices = @transform_2, window_bounds = array<i64: 1, 1, 8, 8>}, {pipeline_mode = #tpu.pipeline_mode<synchronous>, transform_indices = @transform_3, window_bounds = array<i64: 16, 32>}, {pipeline_mode = #tpu.pipeline_mode<synchronous>, transform_indices = @transform_4, window_bounds = array<i64: 32, 16>}, {pipeline_mode = #tpu.pipeline_mode<synchronous>, transform_indices = @transform_5, window_bounds = array<i64: 16, 8>}, {pipeline_mode = #tpu.pipeline_mode<synchronous>, transform_indices = @transform_6, window_bounds = array<i64: 8, 8>}, {pipeline_mode = #tpu.pipeline_mode<synchronous>, transform_indices = @transform_7, window_bounds = array<i64: 8, 16>}, {pipeline_mode = #tpu.pipeline_mode<synchronous>, transform_indices = @transform_8, window_bounds = array<i64: 16, 16>}, {transform_indices = @transform_9, window_bounds = array<i64: 1, 1, 1, 8, 16>}, {transform_indices = @transform_10, window_bounds = array<i64: 1, 1, 1, 8, 16>}, {transform_indices = @transform_11, window_bounds = array<i64: 1, 1, 8, 16>}]} {
    %c0 = arith.constant 0 : index
    %c0_0 = arith.constant 0 : index
    %c0_1 = arith.constant 0 : index
    %c0_2 = arith.constant 0 : index
    %0 = vector.load %arg3[%c0, %c0_0, %c0_1, %c0_2] : memref<1x1x8x16xf32, #tpu.memory_space<vmem>>, vector<1x1x8x16xf32>
    %1 = vector.shape_cast %0 : vector<1x1x8x16xf32> to vector<8x16xf32>
    %c0_3 = arith.constant 0 : index
    %c0_4 = arith.constant 0 : index
    %2 = vector.load %arg6[%c0_3, %c0_4] : memref<16x32xf32, #tpu.memory_space<vmem>>, vector<16x32xf32>
    %cst = arith.constant dense<0.000000e+00> : vector<8x32xf32>
    %3 = tpu.matmul %1, %2, %cst {dimension_numbers = #tpu.dot_dimension_numbers<[1], [0], [0], [1], [0, 0, 1, 1], [], []>} : vector<8x16xf32>, vector<16x32xf32>, vector<8x32xf32> -> vector<8x32xf32>
    %cst_5 = arith.constant 0.000000e+00 : f32
    %4 = vector.broadcast %cst_5 : f32 to vector<8x32xf32>
    %5 = arith.maximumf %3, %4 : vector<8x32xf32>
    %c0_6 = arith.constant 0 : index
    %c0_7 = arith.constant 0 : index
    %6 = vector.load %arg7[%c0_6, %c0_7] : memref<32x16xf32, #tpu.memory_space<vmem>>, vector<32x16xf32>
    %cst_8 = arith.constant dense<0.000000e+00> : vector<8x16xf32>
    %7 = tpu.matmul %5, %6, %cst_8 {dimension_numbers = #tpu.dot_dimension_numbers<[1], [0], [0], [1], [0, 0, 1, 1], [], []>} : vector<8x32xf32>, vector<32x16xf32>, vector<8x16xf32> -> vector<8x16xf32>
    %cst_9 = arith.constant 0.000000e+00 : f32
    %8 = vector.broadcast %cst_9 : f32 to vector<8x16xf32>
    %9 = arith.maximumf %7, %8 : vector<8x16xf32>
    %c0_10 = arith.constant 0 : index
    %c0_11 = arith.constant 0 : index
    %10 = vector.load %arg8[%c0_10, %c0_11] : memref<16x8xf32, #tpu.memory_space<vmem>>, vector<16x8xf32>
    %cst_12 = arith.constant dense<0.000000e+00> : vector<8x8xf32>
    %11 = tpu.matmul %9, %10, %cst_12 {dimension_numbers = #tpu.dot_dimension_numbers<[1], [0], [0], [1], [0, 0, 1, 1], [], []>} : vector<8x16xf32>, vector<16x8xf32>, vector<8x8xf32> -> vector<8x8xf32>
    %c0_13 = arith.constant 0 : index
    %c0_14 = arith.constant 0 : index
    %12 = vector.load %arg9[%c0_13, %c0_14] : memref<8x8xf32, #tpu.memory_space<vmem>>, vector<8x8xf32>
    %cst_15 = arith.constant dense<0.000000e+00> : vector<8x8xf32>
    %13 = tpu.matmul %11, %12, %cst_15 {dimension_numbers = #tpu.dot_dimension_numbers<[1], [0], [0], [1], [0, 0, 1, 1], [], []>} : vector<8x8xf32>, vector<8x8xf32>, vector<8x8xf32> -> vector<8x8xf32>
    %cst_16 = arith.constant 0.000000e+00 : f32
    %14 = vector.broadcast %cst_16 : f32 to vector<8x8xf32>
    %15 = arith.maximumf %13, %14 : vector<8x8xf32>
    %c0_17 = arith.constant 0 : index
    %c0_18 = arith.constant 0 : index
    %16 = vector.load %arg10[%c0_17, %c0_18] : memref<8x16xf32, #tpu.memory_space<vmem>>, vector<8x16xf32>
    %cst_19 = arith.constant dense<0.000000e+00> : vector<8x16xf32>
    %17 = tpu.matmul %15, %16, %cst_19 {dimension_numbers = #tpu.dot_dimension_numbers<[1], [0], [0], [1], [0, 0, 1, 1], [], []>} : vector<8x8xf32>, vector<8x16xf32>, vector<8x16xf32> -> vector<8x16xf32>
    %cst_20 = arith.constant 0.000000e+00 : f32
    %18 = vector.broadcast %cst_20 : f32 to vector<8x16xf32>
    %19 = arith.maximumf %17, %18 : vector<8x16xf32>
    %c0_21 = arith.constant 0 : index
    %c0_22 = arith.constant 0 : index
    %20 = vector.load %arg11[%c0_21, %c0_22] : memref<16x16xf32, #tpu.memory_space<vmem>>, vector<16x16xf32>
    %cst_23 = arith.constant dense<0.000000e+00> : vector<8x16xf32>
    %21 = tpu.matmul %19, %20, %cst_23 {dimension_numbers = #tpu.dot_dimension_numbers<[1], [0], [0], [1], [0, 0, 1, 1], [], []>} : vector<8x16xf32>, vector<16x16xf32>, vector<8x16xf32> -> vector<8x16xf32>
    %c0_24 = arith.constant 0 : index
    %c0_25 = arith.constant 0 : index
    %c0_26 = arith.constant 0 : index
    %c0_27 = arith.constant 0 : index
    %22 = vector.load %arg14[%c0_24, %c0_25, %c0_26, %c0_27] : memref<1x1x8x16xf32, #tpu.memory_space<vmem>>, vector<1x1x8x16xf32>
    %23 = vector.shape_cast %22 : vector<1x1x8x16xf32> to vector<8x16xf32>
    %24 = vector.shape_cast %21 : vector<8x16xf32> to vector<1x1x8x16xf32>
    tpu.vector_store %arg14[%c0_24, %c0_25, %c0_26, %c0_27], %24 {strides = array<i32>} : memref<1x1x8x16xf32, #tpu.memory_space<vmem>>, vector<1x1x8x16xf32>,
    %25 = tpu.iota {dimensions = array<i32: 0>} : vector<8x8xi32>
    %26 = tpu.iota {dimensions = array<i32: 1>} : vector<8x8xi32>
    %27 = arith.addi %25, %26 : vector<8x8xi32>
    %c7_i32 = arith.constant 7 : i32
    %28 = vector.broadcast %c7_i32 : i32 to vector<8x8xi32>
    %29 = arith.cmpi eq, %27, %28 : vector<8x8xi32>
    %cst_28 = arith.constant 1.000000e+00 : f32
    %cst_29 = arith.constant 0.000000e+00 : f32
    %30 = vector.broadcast %cst_28 : f32 to vector<8x8xf32>
    %31 = vector.broadcast %cst_29 : f32 to vector<8x8xf32>
    %32 = arith.select %29, %30, %31 : vector<8x8xi1>, vector<8x8xf32>
    %cst_30 = arith.constant dense<0.000000e+00> : vector<8x8xf32>
    %33 = tpu.matmul %32, %11, %cst_30 {dimension_numbers = #tpu.dot_dimension_numbers<[1], [0], [0], [1], [0, 0, 1, 1], [], []>} : vector<8x8xf32>, vector<8x8xf32>, vector<8x8xf32> -> vector<8x8xf32>
    %c0_31 = arith.constant 0 : index
    %c0_32 = arith.constant 0 : index
    %c0_33 = arith.constant 0 : index
    %c0_34 = arith.constant 0 : index
    %34 = vector.load %arg4[%c0_31, %c0_32, %c0_33, %c0_34] : memref<1x1x8x8xf32, #tpu.memory_space<vmem>>, vector<1x1x8x8xf32>
    %35 = vector.shape_cast %34 : vector<1x1x8x8xf32> to vector<8x8xf32>
    %cst_35 = arith.constant dense<0.000000e+00> : vector<8x8xf32>
    %36 = tpu.matmul %11, %35, %cst_35 {dimension_numbers = #tpu.dot_dimension_numbers<[1], [0], [0], [1], [0, 0, 1, 1], [], []>} : vector<8x8xf32>, vector<8x8xf32>, vector<8x8xf32> -> vector<8x8xf32>
    %c0_36 = arith.constant 0 : index
    %c0_37 = arith.constant 0 : index
    %37 = vector.load %arg9[%c0_36, %c0_37] : memref<8x8xf32, #tpu.memory_space<vmem>>, vector<8x8xf32>
    %cst_38 = arith.constant dense<0.000000e+00> : vector<8x8xf32>
    %38 = tpu.matmul %36, %37, %cst_38 {dimension_numbers = #tpu.dot_dimension_numbers<[1], [0], [0], [1], [0, 0, 1, 1], [], []>} : vector<8x8xf32>, vector<8x8xf32>, vector<8x8xf32> -> vector<8x8xf32>
    %cst_39 = arith.constant 0.000000e+00 : f32
    %39 = vector.broadcast %cst_39 : f32 to vector<8x8xf32>
    %40 = arith.maximumf %38, %39 : vector<8x8xf32>
    %c0_40 = arith.constant 0 : index
    %c0_41 = arith.constant 0 : index
    %41 = vector.load %arg10[%c0_40, %c0_41] : memref<8x16xf32, #tpu.memory_space<vmem>>, vector<8x16xf32>
    %cst_42 = arith.constant dense<0.000000e+00> : vector<8x16xf32>
    %42 = tpu.matmul %40, %41, %cst_42 {dimension_numbers = #tpu.dot_dimension_numbers<[1], [0], [0], [1], [0, 0, 1, 1], [], []>} : vector<8x8xf32>, vector<8x16xf32>, vector<8x16xf32> -> vector<8x16xf32>
    %cst_43 = arith.constant 0.000000e+00 : f32
    %43 = vector.broadcast %cst_43 : f32 to vector<8x16xf32>
    %44 = arith.maximumf %42, %43 : vector<8x16xf32>
    %c0_44 = arith.constant 0 : index
    %c0_45 = arith.constant 0 : index
    %45 = vector.load %arg11[%c0_44, %c0_45] : memref<16x16xf32, #tpu.memory_space<vmem>>, vector<16x16xf32>
    %cst_46 = arith.constant dense<0.000000e+00> : vector<8x16xf32>
    %46 = tpu.matmul %44, %45, %cst_46 {dimension_numbers = #tpu.dot_dimension_numbers<[1], [0], [0], [1], [0, 0, 1, 1], [], []>} : vector<8x16xf32>, vector<16x16xf32>, vector<8x16xf32> -> vector<8x16xf32>
    %c0_47 = arith.constant 0 : index
    %c0_48 = arith.constant 0 : index
    %c0_49 = arith.constant 0 : index
    %c0_50 = arith.constant 0 : index
    %c0_51 = arith.constant 0 : index
    %47 = vector.load %arg12[%c0_47, %c0_48, %c0_49, %c0_50, %c0_51] : memref<1x1x1x8x16xf32, #tpu.memory_space<vmem>>, vector<1x1x1x8x16xf32>
    %48 = vector.shape_cast %47 : vector<1x1x1x8x16xf32> to vector<8x16xf32>
    %49 = vector.shape_cast %46 : vector<8x16xf32> to vector<1x1x1x8x16xf32>
    tpu.vector_store %arg12[%c0_47, %c0_48, %c0_49, %c0_50, %c0_51], %49 {strides = array<i32>} : memref<1x1x1x8x16xf32, #tpu.memory_space<vmem>>, vector<1x1x1x8x16xf32>,
    %c0_52 = arith.constant 0 : index
    %c0_53 = arith.constant 0 : index
    %c0_54 = arith.constant 0 : index
    %c0_55 = arith.constant 0 : index
    %50 = vector.load %arg5[%c0_52, %c0_53, %c0_54, %c0_55] : memref<1x1x8x8xf32, #tpu.memory_space<vmem>>, vector<1x1x8x8xf32>
    %51 = vector.shape_cast %50 : vector<1x1x8x8xf32> to vector<8x8xf32>
    %cst_56 = arith.constant dense<0.000000e+00> : vector<8x8xf32>
    %52 = tpu.matmul %33, %51, %cst_56 {dimension_numbers = #tpu.dot_dimension_numbers<[1], [0], [0], [1], [0, 0, 1, 1], [], []>} : vector<8x8xf32>, vector<8x8xf32>, vector<8x8xf32> -> vector<8x8xf32>
    %c0_57 = arith.constant 0 : index
    %c0_58 = arith.constant 0 : index
    %53 = vector.load %arg9[%c0_57, %c0_58] : memref<8x8xf32, #tpu.memory_space<vmem>>, vector<8x8xf32>
    %cst_59 = arith.constant dense<0.000000e+00> : vector<8x8xf32>
    %54 = tpu.matmul %52, %53, %cst_59 {dimension_numbers = #tpu.dot_dimension_numbers<[1], [0], [0], [1], [0, 0, 1, 1], [], []>} : vector<8x8xf32>, vector<8x8xf32>, vector<8x8xf32> -> vector<8x8xf32>
    %cst_60 = arith.constant 0.000000e+00 : f32
    %55 = vector.broadcast %cst_60 : f32 to vector<8x8xf32>
    %56 = arith.maximumf %54, %55 : vector<8x8xf32>
    %c0_61 = arith.constant 0 : index
    %c0_62 = arith.constant 0 : index
    %57 = vector.load %arg10[%c0_61, %c0_62] : memref<8x16xf32, #tpu.memory_space<vmem>>, vector<8x16xf32>
    %cst_63 = arith.constant dense<0.000000e+00> : vector<8x16xf32>
    %58 = tpu.matmul %56, %57, %cst_63 {dimension_numbers = #tpu.dot_dimension_numbers<[1], [0], [0], [1], [0, 0, 1, 1], [], []>} : vector<8x8xf32>, vector<8x16xf32>, vector<8x16xf32> -> vector<8x16xf32>
    %cst_64 = arith.constant 0.000000e+00 : f32
    %59 = vector.broadcast %cst_64 : f32 to vector<8x16xf32>
    %60 = arith.maximumf %58, %59 : vector<8x16xf32>
    %c0_65 = arith.constant 0 : index
    %c0_66 = arith.constant 0 : index
    %61 = vector.load %arg11[%c0_65, %c0_66] : memref<16x16xf32, #tpu.memory_space<vmem>>, vector<16x16xf32>
    %cst_67 = arith.constant dense<0.000000e+00> : vector<8x16xf32>
    %62 = tpu.matmul %60, %61, %cst_67 {dimension_numbers = #tpu.dot_dimension_numbers<[1], [0], [0], [1], [0, 0, 1, 1], [], []>} : vector<8x16xf32>, vector<16x16xf32>, vector<8x16xf32> -> vector<8x16xf32>
    %c0_68 = arith.constant 0 : index
    %c0_69 = arith.constant 0 : index
    %c0_70 = arith.constant 0 : index
    %c0_71 = arith.constant 0 : index
    %c0_72 = arith.constant 0 : index
    %63 = vector.load %arg13[%c0_68, %c0_69, %c0_70, %c0_71, %c0_72] : memref<1x1x1x8x16xf32, #tpu.memory_space<vmem>>, vector<1x1x1x8x16xf32>
    %64 = vector.shape_cast %63 : vector<1x1x1x8x16xf32> to vector<8x16xf32>
    %65 = vector.shape_cast %62 : vector<8x16xf32> to vector<1x1x1x8x16xf32>
    tpu.vector_store %arg13[%c0_68, %c0_69, %c0_70, %c0_71, %c0_72], %65 {strides = array<i32>} : memref<1x1x1x8x16xf32, #tpu.memory_space<vmem>>, vector<1x1x1x8x16xf32>,
    return
  }
  func.func @transform_0(%arg0: i32, %arg1: i32, %arg2: i32) -> (i32, i32, i32, i32) {
    %c0_i32 = arith.constant 0 : i32
    %c0_i32_0 = arith.constant 0 : i32
    return %arg1, %arg0, %arg2, %c0_i32 : i32, i32, i32, i32
  }
  func.func @transform_1(%arg0: i32, %arg1: i32, %arg2: i32) -> (i32, i32, i32, i32) {
    %c0_i32 = arith.constant 0 : i32
    %c0_i32_0 = arith.constant 0 : i32
    %c0_i32_1 = arith.constant 0 : i32
    %c0_i32_2 = arith.constant 0 : i32
    return %c0_i32, %arg0, %c0_i32_0, %c0_i32_1 : i32, i32, i32, i32
  }
  func.func @transform_2(%arg0: i32, %arg1: i32, %arg2: i32) -> (i32, i32, i32, i32) {
    %c0_i32 = arith.constant 0 : i32
    %c0_i32_0 = arith.constant 0 : i32
    %c0_i32_1 = arith.constant 0 : i32
    %c0_i32_2 = arith.constant 0 : i32
    return %c0_i32, %arg0, %c0_i32_0, %c0_i32_1 : i32, i32, i32, i32
  }
  func.func @transform_3(%arg0: i32, %arg1: i32, %arg2: i32) -> (i32, i32) {
    %c0_i32 = arith.constant 0 : i32
    %c0_i32_0 = arith.constant 0 : i32
    %c0_i32_1 = arith.constant 0 : i32
    return %c0_i32, %c0_i32_0 : i32, i32
  }
  func.func @transform_4(%arg0: i32, %arg1: i32, %arg2: i32) -> (i32, i32) {
    %c0_i32 = arith.constant 0 : i32
    %c0_i32_0 = arith.constant 0 : i32
    %c0_i32_1 = arith.constant 0 : i32
    return %c0_i32, %c0_i32_0 : i32, i32
  }
  func.func @transform_5(%arg0: i32, %arg1: i32, %arg2: i32) -> (i32, i32) {
    %c0_i32 = arith.constant 0 : i32
    %c0_i32_0 = arith.constant 0 : i32
    %c0_i32_1 = arith.constant 0 : i32
    return %c0_i32, %c0_i32_0 : i32, i32
  }
  func.func @transform_6(%arg0: i32, %arg1: i32, %arg2: i32) -> (i32, i32) {
    %c0_i32 = arith.constant 0 : i32
    %c0_i32_0 = arith.constant 0 : i32
    %c0_i32_1 = arith.constant 0 : i32
    return %c0_i32, %c0_i32_0 : i32, i32
  }
  func.func @transform_7(%arg0: i32, %arg1: i32, %arg2: i32) -> (i32, i32) {
    %c0_i32 = arith.constant 0 : i32
    %c0_i32_0 = arith.constant 0 : i32
    %c0_i32_1 = arith.constant 0 : i32
    return %c0_i32, %c0_i32_0 : i32, i32
  }
  func.func @transform_8(%arg0: i32, %arg1: i32, %arg2: i32) -> (i32, i32) {
    %c0_i32 = arith.constant 0 : i32
    %c0_i32_0 = arith.constant 0 : i32
    %c0_i32_1 = arith.constant 0 : i32
    return %c0_i32, %c0_i32_0 : i32, i32
  }
  func.func @transform_9(%arg0: i32, %arg1: i32, %arg2: i32) -> (i32, i32, i32, i32, i32) {
    %c0_i32 = arith.constant 0 : i32
    %c0_i32_0 = arith.constant 0 : i32
    %c0_i32_1 = arith.constant 0 : i32
    return %arg1, %arg0, %c0_i32, %arg2, %c0_i32_0 : i32, i32, i32, i32, i32
  }
  func.func @transform_10(%arg0: i32, %arg1: i32, %arg2: i32) -> (i32, i32, i32, i32, i32) {
    %c0_i32 = arith.constant 0 : i32
    %0 = arith.subi %c0_i32, %arg2 : i32
    %c0_i32_0 = arith.constant 0 : i32
    %c0_i32_1 = arith.constant 0 : i32
    %c0_i32_2 = arith.constant 0 : i32
    return %arg1, %arg0, %c0_i32_0, %0, %c0_i32_1 : i32, i32, i32, i32, i32
  }
  func.func @transform_11(%arg0: i32, %arg1: i32, %arg2: i32) -> (i32, i32, i32, i32) {
    %c0_i32 = arith.constant 0 : i32
    %c0_i32_0 = arith.constant 0 : i32
    return %arg1, %arg0, %arg2, %c0_i32 : i32, i32, i32, i32
  }
}

</mosaic_0001>

<bundles_post_ra>
// kernel: tpu_custom_call.1
= control target key start
LH: loop header
LB: loop body
LE: loop exit
PB: predicated region body
PF: predicated region fallthrough
CT: control target
= control target key end

     0   :  { %s3109_s0 = inlined_call_operand.vmem [shape: f32[2,2,8,16], index: 0, kind: input, shape index: {}]   ;;  %s3110_s1 = inlined_call_operand.vmem [shape: f32[1,2,8,8], index: 1, kind: input, shape index: {}]   ;;  %s3111_s2 = inlined_call_operand.hbm [shape: f32[1,2,8,8], index: 2, kind: input, shape index: {}]   ;;  %s3112_s3 = inlined_call_operand.vmem [shape: f32[16,32], index: 3, kind: input, shape index: {}]   ;;  %s3113_s4 = inlined_call_operand.vmem [shape: f32[32,16], index: 4, kind: input, shape index: {}]   ;;  %s3114_s5 = inlined_call_operand.vmem [shape: f32[16,8], index: 5, kind: input, shape index: {}]   ;;  %s3115_s6 = inlined_call_operand.hbm [shape: f32[8,8], index: 6, kind: input, shape index: {}]   ;;  %s3116_s7 = inlined_call_operand.hbm [shape: f32[8,16], index: 7, kind: input, shape index: {}]   ;;  %s3117_s8 = inlined_call_operand.vmem [shape: f32[16,16], index: 8, kind: input, shape index: {}]   ;;  %s3118_s9 = inlined_call_operand.hbm [shape: f32[2,2,1,8,16], index: 9, kind: output, shape index: {0}]   ;;  %s3119_s10 = inlined_call_operand.hbm [shape: f32[2,2,1,8,16], index: 10, kind: output, shape index: {1}]   ;;  %s3120_s11 = inlined_call_operand.hbm [shape: f32[2,2,8,16], index: 11, kind: output, shape index: {2}]  }
   0x1   :  { %3141 = sst [smem:[#allocation22_spill]] %s3109_s0 }
   0x2   :  { %3142 = sst [smem:[#allocation23_spill]] %s3110_s1 }
   0x3   :  { %3143 = sst [smem:[#allocation24_spill]] %s3111_s2 }
   0x4   :  { %3144 = sst [smem:[#allocation25_spill]] %s3114_s5 }
   0x5   :  { %3145 = sst [smem:[#allocation26_spill]] %s3115_s6 }
   0x6   :  { %3146 = sst [smem:[#allocation27_spill]] %s3116_s7 }
   0x7   :  { %3147 = sst [smem:[#allocation28_spill]] %s3117_s8 }
   0x8   :  { %3148 = sst [smem:[#allocation29_spill]] %s3118_s9 }
   0x9   :  { %3149 = sst [smem:[#allocation30_spill]] %s3119_s10 }
   0xa   :  { %3150 = sst [smem:[#allocation31_spill]] %s3120_s11 }
   0xb   :  { %17 = vsyncpa [#allocation3], 0 }
   0xc   :  { %19 = vsyncpa [#allocation3 + $0x1], 0 }
   0xd   :  { %20 = vsyncpa [#allocation6], 0 }
   0xe   :  { %21 = vsyncpa [#allocation4], 0 }
   0xf   :  { %23 = vsyncpa [#allocation4 + $0x1], 0 }
  0x10   :  { %24 = vsyncpa [#allocation10], 0 }
  0x11   :  { %26 = vsyncpa [#allocation10 + $0x1], 0  ;;  %s2613_s17 = smov 0   ;;  %s2615_s18 = smov 0  }
  0x12   :  { %s2617_s19 = smov 0   ;;  %s2619_s20 = smov 0  }
  0x13   :  { %s2621_s21 = smov 0   ;;  %s2623_s22 = smov 0  }
  0x14   :  { %s2625_s23 = smov 0   ;;  %s2627_s24 = smov 0  }
  0x15   :  { %s2629_s25 = smov 0   ;;  %s2631_s26 = smov 0  }
  0x16   :  { %s2633_s27 = smov 0  }
  0x17 LB: > { %3151 = sst [smem:[#allocation16_spill]] %s2502_s17  ;;  %s2667_s28 = sadd.s32 4294967295, %s2542_s27   ;;  %s2542_s27 = sphi %s2633_s27, %s32_s27   ;;  %s2538_s26 = sphi %s2631_s26, %s3198_s26   ;;  %s2534_s25 = sphi %s2629_s25, %s3197_s25   ;;  %s2530_s24 = sphi %s2627_s24, %s3196_s24   ;;  %s2526_s23 = sphi %s2625_s23, %s3189_s23   ;;  %s2522_s22 = sphi %s2623_s22, %s3195_s22   ;;  %s2518_s21 = sphi %s2621_s21, %s3194_s21   ;;  %s2514_s20 = sphi %s2619_s20, %s3193_s20   ;;  %s2510_s19 = sphi %s2617_s19, %s3192_s19   ;;  %s2506_s18 = sphi %s2615_s18, %s3191_s18   ;;  %s2502_s17 = sphi %s2613_s17, %s3188_s17  }
  0x18   : > { %3152 = sst [smem:[#allocation17_spill]] %s2506_s18  ;;  %s3121_s29 = sadd.s32 4294967294, %s2542_s27  }
  0x19   : > { %3153 = sst [smem:[#allocation18_spill]] %s2534_s25  ;;  %p127_p0 = scmp.ne.s32.totalorder %s2518_s21, %s2514_s20 }
  0x1a   : > { %p3131_p1 = scmp.eq.s32.totalorder %s2667_s28, 0  ;;  %p280_p2 = scmp.ne.s32.totalorder %s2510_s19, %s2506_s18 }
  0x1b   : > { %p281_p4 = scmp.eq.s32.totalorder %s2667_s28, 3  ;;  %p286_p5 = scmp.ne.s32.totalorder %s2506_s18, %s2502_s17 }
  0x1c   : > { %p2677_p3 = por %p3131_p1, %p127_p0  ;;  %p287_p6 = scmp.eq.s32.totalorder %s3121_s29, 3 }
  0x1d   : > { %p2686_p7 = por %p281_p4, %p280_p2  ;;  %p1942_p8 = scmp.ge.s32.totalorder %s2542_s27, 1 }
  0x1e   : > { %s3154_s12 = scalar_select %p2677_p3, 1, 0 }
  0x1f   : > { %s3155_s13 = scalar_select %p2686_p7, 1, 0 }
  0x20   : > { %p2691_p9 = por %p287_p6, %p286_p5  ;;  %p356_p10 = scmp.lt.s32.totalorder %s2542_s27, 5 }
  0x21   : > { %3156 = sst [smem:[#allocation19_spill]] %s3155_s13  ;;  %s2544_s16 = smov [#allocation5]  }
  0x22   : > { %s3157_s14 = scalar_select %p2691_p9, 1, 0 }
  0x23   : > { %p2696_p11 = pnand %p1942_p8, %p356_p10  ;;  %s378_s20 = sshll.u32 %s2544_s16, 4  ;;  %s379_s20 = int_to_ptr.vmem [resolvable:$true] %s378_s20 }
  0x24   : > { %3158 = sst [smem:[#allocation20_spill]] %s3157_s14  ;;  %s2545_s29 = smov [#allocation7]  }
  0x25   : > { %s3159_s15 = scalar_select %p2696_p11, 1, 0 }
  0x26   : > { %p2150_p12 = pneg %p2696_p11  ;;  %s389_s30 = sshll.u32 %s2545_s29, 4  ;;  %s2708_s30 = int_to_ptr.vmem [resolvable:$true] %s389_s30 }
  0x27   : > { %s3161_s6 = sld [smem:[#allocation26_spill]] }
  0x28   : > { %p2704_p13 = pnand %p2150_p12, %p3131_p1 }
  0x2a   : > { %p2272_p2 = pneg %p2704_p13 }
  0x2d   : > { %s2270_s10 = scalar_lea.hbm %s3161_s6, 128 }
  0x2e   : > { %p2271_p0 = scmp.ne.s32.totalorder %s3161_s6, %s2270_s10  ;;  %p2277_p6 = scmp.lt.u32.totalorder %s2270_s10, %s3161_s6 }
  0x30   : > { %p2273_p4 = pnand %p2272_p2, %p2271_p0 }
  0x32   : > { %p2274_p5 = pneg %p2273_p4 }
  0x34   : > { %p2279_p8 = pnand %p2277_p6, %p2274_p5 }
  0x36   : > { %2282 = shalt.err (!%p2279_p8)
}
  0x37   : > { %s2283_s18 = scalar_lea.vmem %s379_s20, 128  ;;  %p2291_p9 = scmp.lt.s32.totalorder %s379_s20, %s379_s20 }
  0x38   : > { %p2284_p10 = scmp.ne.s32.totalorder %s379_s20, %s2283_s18  ;;  %p2292_p7 = scmp.lt.s32.totalorder %s2283_s18, %s2283_s18 }
  0x3a   : > { %p2286_p12 = pnand %p2284_p10, %p2272_p2  ;;  %p2293_p3 = por %p2292_p7, %p2291_p9 }
  0x3c   : > { %p2287_p1 = pneg %p2286_p12 }
  0x3e   : > { %p2294_p11 = pnand %p2293_p3, %p2287_p1 }
  0x40   : > { %2297 = shalt.err (!%p2294_p11)
}
  0x41   : > { %2153 = dma.hbm_to_vmem [thread:$0]  (!%p2704_p13), %s3161_s6, 128, %s379_s20, [#allocation6]  }
  0x42   : > { %s3162_s7 = sld [smem:[#allocation27_spill]] }
  0x48   : > { %s2298_s14 = scalar_lea.hbm %s3162_s7, 128 }
  0x49   : > { %p2299_p0 = scmp.ne.s32.totalorder %s3162_s7, %s2298_s14  ;;  %p2305_p3 = scmp.lt.u32.totalorder %s2298_s14, %s3162_s7 }
  0x4b   : > { %p2301_p7 = pnand %p2299_p0, %p2272_p2 }
  0x4d   : > { %p2302_p1 = pneg %p2301_p7 }
  0x4f   : > { %p2307_p9 = pnand %p2305_p3, %p2302_p1 }
  0x51   : > { %2310 = shalt.err (!%p2307_p9)
}
  0x52   : > { %s2311_s20 = scalar_lea.vmem %s2708_s30, 128  ;;  %p2319_p6 = scmp.lt.s32.totalorder %s2708_s30, %s2708_s30 }
  0x53   : > { %p2312_p11 = scmp.ne.s32.totalorder %s2708_s30, %s2311_s20  ;;  %p2320_p8 = scmp.lt.s32.totalorder %s2311_s20, %s2311_s20 }
  0x55   : > { %p2314_p4 = pnand %p2312_p11, %p2272_p2  ;;  %p2321_p10 = por %p2320_p8, %p2319_p6 }
  0x57   : > { %p2315_p5 = pneg %p2314_p4 }
  0x59   : > { %p2322_p12 = pnand %p2321_p10, %p2315_p5 }
  0x5b   : > { %2325 = shalt.err (!%p2322_p12)
}
  0x5c   : > { %2156 = dma.hbm_to_vmem [thread:$0]  (!%p2704_p13), %s3162_s7, 128, %s2708_s30, [#allocation6]  }
  0x5d   : > { %s47_s11 = sadd.s32 1, %s2534_s25  ;;  %s51_s10 = sadd.s32 1, %s2538_s26 }
  0x5e   : > { %p49_p2 = scmp.ge.s32.totalorder %s47_s11, 2  ;;  %s114_s17 = sadd.s32 1, %s2522_s22 }
  0x5f   : > { %p121_p0 = scmp.ne.s32.totalorder %s2522_s22, %s2518_s21  ;;  %p122_p7 = scmp.eq.s32.totalorder %s2542_s27, 0 }
  0x60   : > { %s3200_s11 = smov (%p49_p2, %s47_s11), 0  ;;  %s3202_s10 = smov (!%p49_p2, %s51_s10), %s2538_s26 }
  0x61   : > { %3163 = sst [smem:[#allocation21_spill]] %s3200_s11  ;;  %p2766_p1 = por %p122_p7, %p121_p0 }
  0x62   : > { %s263_s14 = ssub.s32 %s2534_s25, %s3200_s11  ;;  %p53_p13 = scmp.ge.s32.totalorder %s3202_s10, 2 }
  0x63   : > { %p2173_p3 = scmp.lt.s32.totalorder %s2542_s27, 4  ;;  %s424_s30 = sand.u32 1, %s2522_s22  }
  0x64   : > { %s1947_s16 = sshll.u32 %s2538_s26, 7  ;;  %s3204_s10 = smov (%p53_p13, %s3202_s10), 0 }
  0x65   : > { %s1946_s29 = sshll.u32 %s424_s30, 3  ;;  %s111_s18 = ssub.s32 %s2538_s26, %s3204_s10 }
  0x66   : > { %p112_p9 = scmp.eq.s32.totalorder %s111_s18, 0  ;;  %s265_s20 = sor.u32 %s263_s14, %s111_s18 }
  0x67   : > { %p268_p11 = scmp.eq.s32.totalorder %s265_s20, 0  ;;  %s3165_s2 = sld [smem:[#allocation24_spill]] }
  0x68   : > { %s2785_s7 = scalar_select %p112_p9, %s2522_s22, %s114_s17  }
  0x69   : > { %s3166_s11 = sadd.s32 1, %s2510_s19  ;;  %s428_s8 = scalar_lea.vmem [#allocation2], %s1946_s29 }
  0x6a   : > { %s2790_s25 = scalar_select %p268_p11, %s2510_s19, %s3166_s11  }
  0x6b   : > { %s435_s5 = sshll.u32 %s428_s8, 4  ;;  %p2796_p4 = pnand %p2173_p3, %p2766_p1  ;;  %s2800_s5 = int_to_ptr.vmem [resolvable:$true] %s435_s5 }
  0x6d   : > { %s2782_s6 = scalar_lea.hbm %s3165_s2, %s1947_s16  ;;  %s425_s16 = scalar_lea.sflag [#allocation3], %s424_s30 }
  0x6e   : > { %s2326_s18 = scalar_lea.hbm %s2782_s6, 128  ;;  %p2328_p6 = pneg %p2796_p4 }
  0x6f   : > { %p2327_p5 = scmp.ne.s32.totalorder %s2782_s6, %s2326_s18  ;;  %s2331_s17 = scalar_lea.hbm %s3165_s2, 256 }
  0x70   : > { %p2332_p12 = scmp.lt.u32.totalorder %s2782_s6, %s3165_s2  ;;  %p2333_p2 = scmp.lt.u32.totalorder %s2331_s17, %s2326_s18 }
  0x71   : > { %p2329_p8 = pnand %p2328_p6, %p2327_p5  ;;  %p2335_p7 = scmp.lt.u32.totalorder %s2326_s18, %s2782_s6 }
  0x72   : > { %p2334_p0 = por %p2333_p2, %p2332_p12 }
  0x73   : > { %p2330_p10 = pneg %p2329_p8 }
  0x74   : > { %p2336_p1 = por %p2335_p7, %p2334_p0 }
  0x76   : > { %p2337_p13 = pnand %p2336_p1, %p2330_p10 }
  0x78   : > { %2340 = shalt.err (!%p2337_p13)
}
  0x79   : > { %s2341_s30 = scalar_lea.vmem %s2800_s5, 128  ;;  %s2546_s20 = smov [#allocation2]  }
  0x7a   : > { %p2342_p3 = scmp.ne.s32.totalorder %s2800_s5, %s2341_s30  ;;  %s2346_s1 = sshll.u32 %s2546_s20, 4  ;;  %s2347_s1 = int_to_ptr.vmem [resolvable:$false] %s2346_s1 }
  0x7b   : > { %s2348_s9 = scalar_lea.vmem %s2347_s1, 256  ;;  %p2349_p5 = scmp.lt.s32.totalorder %s2800_s5, %s2347_s1 }
  0x7c   : > { %p2344_p9 = pnand %p2342_p3, %p2328_p6  ;;  %p2350_p8 = scmp.lt.s32.totalorder %s2348_s9, %s2341_s30 }
  0x7e   : > { %p2345_p11 = pneg %p2344_p9  ;;  %p2351_p12 = por %p2350_p8, %p2349_p5 }
  0x80   : > { %p2352_p2 = pnand %p2351_p12, %p2345_p11 }
  0x82   : > { %2355 = shalt.err (!%p2352_p2)
}
  0x83   : > { %2160 = dma.hbm_to_vmem [thread:$0]  (!%p2796_p4), %s2782_s6, 128, %s2800_s5, %s425_s16  }
  0x84   : > { %p3168_p10 = scmp.ne.s32.totalorder %s3159_s15, 0 }
  0x85   : > { %s446_s18 = sand.u32 (!%p3168_p10), 1, %s2518_s21   ;;  %p3169_p6 = scmp.ne.s32.totalorder (!%p3168_p10), %s3154_s12, 0 }
  0x86   : > { %444 = sbr.rel (%p3168_p10) target bundleno = 2546 (0x9f2), region = 56  ;;  %s2830_s8 = sshll.u32 (!%p3168_p10), %s446_s18, 3 }
  0x87   : > { %s447_s11 = scalar_lea.sflag (!%p3168_p10), [#allocation3], %s446_s18  ;;  %s450_s17 = scalar_lea.vmem (!%p3168_p10), [#allocation2], %s2830_s8 }
  0x8d   : > { %2485 = dma.done.wait (%p3169_p6), %s447_s11, 128  }
  0x8e   : > { %2487 = vsyncadd (%p3169_p6), %s447_s11, 4294967168  ;;  %p3170_p0 = scmp.eq.s32.totalorder %s2667_s28, 0 }
  0x90   : > { %2489 = dma.done.wait (%p3170_p0), [#allocation6], 256   ;;  %p3171_p4 = pmov %p3170_p0 }
  0x91   : > { %p522_p7 = scmp.lt.s32.totalorder %s2526_s23, 1  ;;  %v2547_v0 = vmov 0.0|0.0   ;;  %vm2548_vm0 = vmmov 0   ;;  %v2549_v1 = vmov 0.0   ;;  %p524_p1 = scmp.lt.s32.totalorder %s2530_s24, 1  ;;  %v539_v2 = vld [vmem:[%s3112_s3] sm:$0xff]  ;;  %v997_v35 = vlaneseq }
  0x92   : > { %2491 = vsyncadd (%p3171_p4), [#allocation6], 4294967040  ;;  %2113 = vmatprep.subr.bf16.mxu0 %v2547_v0  ;;  %2026 = vmatprep.mubr.msk.f32.mxu0 %vm2548_vm0, %v2549_v1  ;;  %v540_v3 = vld [vmem:[%s3112_s3 + $0x8] sm:$0xff]  ;;  %s3172_s0 = sld [smem:[#allocation22_spill]]  ;;  %v616_v4 = vld [vmem:[%s3113_s4] sm:$0xff]  ;;  %vm541_vm1 = vcmask 130048  }
  0x93   : > { %s523_s5 = scalar_select %p522_p7, %s2526_s23, 1  ;;  %2116 = vmatprep.subr.bf16.mxu1 %v2547_v0  ;;  %2037 = vmatprep.mubr.msk.f32.mxu1 %vm2548_vm0, %v2549_v1  ;;  %v2114_v5 = vpack.c.bf16 %v540_v3, %v539_v2  ;;  %v617_v6 = vld [vmem:[%s3113_s4 + $0x8] sm:$0xff]  ;;  %v618_v9 = vld [vmem:[%s3113_s4 + $0x10] sm:$0xff]  ;;  %v619_v10 = vld [vmem:[%s3113_s4 + $0x18] sm:$0xff]  ;;  %vm620_vm2 = vcmask 261120   ;;  %vm771_vm3 = vcmask 64512  }
  0x94   : > { %s2851_s6 = scalar_select %p524_p1, %s2530_s24, 1  ;;  %v2117_v7 = vpack.c.bf16 %v617_v6, %v616_v4  ;;  %v2120_v11 = vpack.c.bf16 %v619_v10, %v618_v9  ;;  %v2890_v21 = vld [vmem:[#allocation5] sm:$0xff]  ;;  %v2897_v22 = vld [vmem:[#allocation7] sm:$0xff]  ;;  %v998_v36 = vshrl.u32 %v997_v35, 7  ;;  %v1000_v37 = vand.u32 127, %v997_v35  ;;  %v1374_v49 = vld [vmem:[%s450_s17] sm:$0xff] }
  0x95   : > { %s1955_s12 = sshll.u32 %s523_s5, 1  ;;  %2115 = vmatpush3.bf16.msra.mxu0 %v2114_v5  ;;  %s3173_s20 = sld [smem:[#allocation25_spill]] }
  0x96   : > { %s530_s15 = sadd.s32 %s1955_s12, %s2851_s6  ;;  %2118 = vmatpush3.bf16.msra.mxu1 %v2117_v7  ;;  %2122 = vmatprep.subr.bf16.mxu0 %v2547_v0  ;;  %s3175_s12 = sld [smem:[#allocation28_spill]]  ;;  %v1001_v38 = vadd.s32 %v1000_v37, %v998_v36 }
  0x97   : > { %s1956_s14 = sshll.u32 %s530_s15, 3  ;;  %2119 = vmatprep.subr.bf16.mxu1 %v2547_v0  ;;  %s1957_s16 = sshll.u32 %s2851_s6, 3 }
  0x98   : > { %s532_s9 = scalar_lea.vmem %s3172_s0, %s1956_s14  ;;  %s3176_s30 = sld [smem:[#allocation23_spill]]  ;;  %vm1002_vm4 = vcmp.eq.s32.totalorder %v1001_v38, 7 }
  0x99   : > { %v538_v8 = vld [vmem:[%s532_s9] sm:$0xff]  ;;  %s3177_s9 = sld [smem:[#allocation17_spill]]  ;;  %v1003_v39 = vsel %vm1002_vm4, 1.0, %v2549_v1  ;;  %s3178_s17 = sld [smem:[#allocation19_spill]] }
  0x9a   : > { %2027 = vmatmul.mubr.msk.f32.vlgmr.msra.gmra.mrb[0].mxu0 %vm541_vm1, %v538_v8  ;;  %2121 = vmatpush3.bf16.msra.mxu1 %v2120_v11  ;;  %s1976_s5 = sshll.u32 %s2526_s23, 1  ;;  %s3179_s29 = sld [smem:[#allocation29_spill]] }
  0x9b   : > { %2044 = vmatprep.mubr.msk.f32.mxu0 %vm2548_vm0, %v2549_v1  ;;  %2052 = vmatprep.subr.mxu1 %v2549_v1  ;;  %s3174_s1 = smov %s3173_s20  ;;  %v695_v12 = vld [vmem:[%s3173_s20] sm:$0xff]  ;;  %s1697_s15 = sadd.s32 %s2530_s24, %s1976_s5 }
  0x9c   : > { %v696_v13 = vld [vmem:[%s3174_s1 + $0x8] sm:$0xff]  ;;  %v921_v25 = vld [vmem:[%s3175_s12] sm:$0xff]  ;;  %s2976_s14 = sshll.u32 %s1697_s15, 7  ;;  %s2550_s1 = smov [#allocation8]  }
  0x9d   : > { %v2123_v14 = vpack.c.bf16 %v696_v13, %v695_v12  ;;  %v922_v26 = vld [vmem:[%s3175_s12 + $0x8] sm:$0xff]  ;;  %s2360_s23 = sshll.u32 %s2550_s1, 4  ;;  %s2361_s23 = int_to_ptr.vmem [resolvable:$false] %s2360_s23 }
  0x9e   : > { %v2910_v27 = vpack.c.bf16 %v922_v26, %v921_v25  ;;  %s536_s20 = scalar_lea.vmem %s3176_s30, %s1957_s16  ;;  %s2362_s24 = scalar_lea.vmem %s2361_s23, 256 }
  0x9f   : > { %2124 = vmatpush3.bf16.msra.mxu0 %v2123_v14  ;;  %v1077_v34 = vld [vmem:[%s536_s20] sm:$0xff]  ;;  %s505_s6 = sand.u32 1, %s3177_s9   ;;  %p3180_p3 = scmp.ne.s32.totalorder %s3178_s17, 0 }
  0xa0   : > { %2047 = vmatprep.subr.mxu0 %v2549_v1  ;;  %s2940_s18 = sshll.u32 %s505_s6, 3  ;;  %s2982_s30 = scalar_lea.hbm %s3179_s29, %s2976_s14 }
  0xa1   : > { %s3139_s11 = scalar_lea.vmem [#allocation11], %s2940_s18  ;;  %s507_s8 = scalar_lea.vmem [#allocation8], %s2940_s18 }
  0xa2   : > { %s1701_s20 = sshll.u32 %s507_s8, 4  ;;  %s1702_s20 = int_to_ptr.vmem [resolvable:$true] %s1701_s20 }
  0xa3   : > { %s2356_s0 = scalar_lea.vmem %s1702_s20, 128  ;;  %p2363_p5 = scmp.lt.s32.totalorder %s1702_s20, %s2361_s23 }
  0xa4   : > { %p2357_p13 = scmp.ne.s32.totalorder %s1702_s20, %s2356_s0  ;;  %p2364_p8 = scmp.lt.s32.totalorder %s2362_s24, %s2356_s0 }
  0xa6   : > { %p2358_p9 = pnand %p2357_p13, %p3180_p3  ;;  %p2365_p12 = por %p2364_p8, %p2363_p5 }
  0xa8   : > { %p2359_p11 = pneg %p2358_p9 }
  0xaa   : > { %p2366_p2 = pnand %p2365_p12, %p2359_p11 }
 0x16d   : > { %v611_v15 = vpop.f32.mrb[0].mxu0 }
 0x16e   : > { %v615_v16 = vmax.f32 %v611_v15, 0.0  ;;  %v2028_v17 = vpop.f32.mrb[1].mxu0 }
 0x170   : > { %2038 = vmatmul.mubr.msk.f32.vlgmr.msra.gmra.mrb[0].mxu1 %vm620_vm2, %v615_v16 }
 0x171   : > { %2054 = vmatprep.mubr.msk.f32.mxu1 %vm2548_vm0, %v2549_v1  ;;  %2053 = vmatpush3.msra.mxu1 %v2897_v22 }
 0x172   : > { %2064 = vmatprep.subr.mxu1 %v2549_v1 }
 0x243   : > { %v690_v18 = vpop.f32.mrb[0].mxu1 }
 0x244   : > { %v694_v19 = vmax.f32 %v690_v18, 0.0  ;;  %v2039_v20 = vpop.f32.mrb[1].mxu1 }
 0x246   : > { %2045 = vmatmul.mubr.msk.f32.vlgmr.msra.gmra.mrb[2].mxu0 %vm541_vm1, %v694_v19 }
 0x247   : > { %2048 = vmatpush3.msra.mxu0 %v2890_v21  ;;  %2049 = vmatprep.mubr.msk.f32.mxu0 %vm2548_vm0, %v2549_v1 }
 0x248   : > { %2125 = vmatprep.subr.bf16.mxu0 %v2547_v0 }
 0x319   : > { %v766_v23 = vpop.f32.mrb[2].mxu0 }
 0x31a   : > { %v2046_v24 = vpop.f32.mrb[3].mxu0  ;;  %2050 = vmatmul.mubr.msk.f32.vlgmr.msra.gmra.mrb[4].mxu0 %vm771_vm3, %v766_v23 }
 0x31b   : > { %2061 = vmatprep.mubr.msk.f32.mxu0 %vm2548_vm0, %v2549_v1  ;;  %2127 = vmatpush3.bf16.msra.mxu0 %v2910_v27 }
 0x31c   : > { %2069 = vmatprep.subr.mxu0 %v2549_v1 }
 0x3ed   : > { %v841_v28 = vpop.f32.mrb[4].mxu0 }
 0x3ee   : > { %v845_v29 = vmax.f32 %v841_v28, 0.0  ;;  %v2051_v30 = vpop.f32.mrb[5].mxu0 }
 0x3f0   : > { %2055 = vmatmul.mubr.msk.f32.vlgmr.msra.gmra.mrb[2].mxu1 %vm771_vm3, %v845_v29 }
 0x3f1   : > { %2065 = vmatpush3.msra.mxu1 %v766_v23  ;;  %2066 = vmatprep.mubr.msk.f32.mxu1 %vm2548_vm0, %v2549_v1 }
 0x3f2   : > { %2074 = vmatprep.subr.mxu1 %v2549_v1 }
 0x3f4   : > { %2067 = vmatmul.mubr.msk.f32.vlgmr.msra.gmra.mrb[4].mxu1 %vm771_vm3, %v1003_v39 }
 0x3f5   : > { %2075 = vmatpush3.msra.mxu1 %v2890_v21  ;;  %2076 = vmatprep.mubr.msk.f32.mxu1 %vm2548_vm0, %v2549_v1 }
 0x3f6   : > { %2128 = vmatprep.subr.bf16.mxu1 %v2547_v0 }
 0x4c3   : > { %v916_v31 = vpop.f32.mrb[2].mxu1 }
 0x4c4   : > { %v920_v32 = vmax.f32 %v916_v31, 0.0  ;;  %v2056_v33 = vpop.f32.mrb[3].mxu1 }
 0x4c6   : > { %2062 = vmatmul.mubr.msk.f32.vlgmr.msra.gmra.mrb[6].mxu0 %vm541_vm1, %v920_v32 }
 0x4c7   : > { %2070 = vmatpush3.msra.mxu0 %v1077_v34  ;;  %2071 = vmatprep.mubr.msk.f32.mxu0 %vm2548_vm0, %v2549_v1  ;;  %v1073_v44 = vpop.f32.mrb[4].mxu1 }
 0x4c8   : > { %2079 = vmatprep.subr.mxu0 %v2549_v1  ;;  %v2068_v45 = vpop.f32.mrb[5].mxu1 }
 0x4ca   : > { %2072 = vmatmul.mubr.msk.f32.vlgmr.msra.gmra.mrb[8].mxu0 %vm771_vm3, %v766_v23 }
 0x4cb   : > { %2080 = vmatpush3.msra.mxu0 %v2897_v22  ;;  %2081 = vmatprep.mubr.msk.f32.mxu0 %vm2548_vm0, %v2549_v1 }
 0x4cc   : > { %2091 = vmatprep.subr.mxu0 %v2549_v1 }
 0x599   : > { %v992_v40 = vpop.f32.mrb[6].mxu0 }
 0x59a   : > { %996 = vst.msk [vmem:[%s3139_s11] sm:$0xff] %vm541_vm1, %v992_v40  ;;  %v2063_v41 = vpop.f32.mrb[7].mxu0  ;;  %s1675_s11 = scalar_lea.sflag [#allocation4], %s505_s6 }
 0x59d   : > { %v1144_v42 = vpop.f32.mrb[8].mxu0 }
 0x59e   : > { %v2073_v43 = vpop.f32.mrb[9].mxu0  ;;  %2077 = vmatmul.mubr.msk.f32.vlgmr.msra.gmra.mrb[6].mxu1 %vm771_vm3, %v1144_v42 }
 0x59f   : > { %2130 = vmatpush3.bf16.msra.mxu1 %v2910_v27  ;;  %2088 = vmatprep.mubr.msk.f32.mxu1 %vm2548_vm0, %v2549_v1 }
 0x5a0   : > { %2096 = vmatprep.subr.mxu1 %v2549_v1 }
 0x671   : > { %v1218_v46 = vpop.f32.mrb[6].mxu1 }
 0x672   : > { %v1222_v47 = vmax.f32 %v1218_v46, 0.0  ;;  %v2078_v48 = vpop.f32.mrb[7].mxu1 }
 0x674   : > { %2082 = vmatmul.mubr.msk.f32.vlgmr.msra.gmra.mrb[10].mxu0 %vm771_vm3, %v1222_v47 }
 0x675   : > { %2092 = vmatpush3.msra.mxu0 %v1374_v49  ;;  %2093 = vmatprep.mubr.msk.f32.mxu0 %vm2548_vm0, %v2549_v1 }
 0x676   : > { %2101 = vmatprep.subr.mxu0 %v2549_v1 }
 0x678   : > { %2094 = vmatmul.mubr.msk.f32.vlgmr.msra.gmra.mrb[12].mxu0 %vm771_vm3, %v1073_v44 }
 0x679   : > { %2102 = vmatpush3.msra.mxu0 %v2897_v22  ;;  %2103 = vmatprep.mubr.msk.f32.mxu0 %vm2548_vm0, %v2549_v1 }
 0x747   : > { %v1293_v50 = vpop.f32.mrb[10].mxu0 }
 0x748   : > { %v1297_v51 = vmax.f32 %v1293_v50, 0.0  ;;  %v2083_v52 = vpop.f32.mrb[11].mxu0 }
 0x74a   : > { %2089 = vmatmul.mubr.msk.f32.vlgmr.msra.gmra.mrb[8].mxu1 %vm541_vm1, %v1297_v51 }
 0x74b   : > { %2097 = vmatpush3.msra.mxu1 %v2890_v21  ;;  %v1444_v53 = vpop.f32.mrb[12].mxu0  ;;  %2098 = vmatprep.mubr.msk.f32.mxu1 %vm2548_vm0, %v2549_v1 }
 0x74c   : > { %v2095_v54 = vpop.f32.mrb[13].mxu0  ;;  %2131 = vmatprep.subr.bf16.mxu1 %v2547_v0 }
 0x74e   : > { %2099 = vmatmul.mubr.msk.f32.vlgmr.msra.gmra.mrb[10].mxu1 %vm771_vm3, %v1444_v53 }
 0x74f   : > { %2133 = vmatpush3.bf16.msra.mxu1 %v2910_v27  ;;  %2110 = vmatprep.mubr.msk.f32.mxu1 %vm2548_vm0, %v2549_v1 }
 0x81d   : > { %v1369_v55 = vpop.f32.mrb[8].mxu1 }
 0x81e   : > { %1373 = vst.msk [vmem:[%s507_s8] sm:$0xff] %vm541_vm1, %v1369_v55  ;;  %v2090_v56 = vpop.f32.mrb[9].mxu1 }
 0x821   : > { %v1518_v57 = vpop.f32.mrb[10].mxu1 }
 0x822   : > { %v1522_v58 = vmax.f32 %v1518_v57, 0.0  ;;  %v2100_v59 = vpop.f32.mrb[11].mxu1 }
 0x824   : > { %2104 = vmatmul.mubr.msk.f32.vlgmr.msra.gmra.mrb[14].mxu0 %vm771_vm3, %v1522_v58 }
 0x8f7   : > { %v1593_v60 = vpop.f32.mrb[14].mxu0 }
 0x8f8   : > { %v1597_v61 = vmax.f32 %v1593_v60, 0.0  ;;  %v2105_v62 = vpop.f32.mrb[15].mxu0 }
 0x8fa   : > { %2111 = vmatmul.mubr.msk.f32.vlgmr.msra.gmra.mrb[12].mxu1 %vm541_vm1, %v1597_v61 }
 0x8fb   : > { %2369 = shalt.err (!%p2366_p2)
}
 0x8fc   : > { %s2370_s9 = scalar_lea.hbm %s2982_s30, 128  ;;  %s2374_s1 = scalar_lea.hbm %s3179_s29, 512 }
 0x8fd   : > { %p2371_p10 = scmp.ne.s32.totalorder %s2982_s30, %s2370_s9  ;;  %p2375_p4 = scmp.lt.u32.totalorder %s2982_s30, %s3179_s29 }
 0x8fe   : > { %p2376_p7 = scmp.lt.u32.totalorder %s2374_s1, %s2370_s9  ;;  %p2378_p13 = scmp.lt.u32.totalorder %s2370_s9, %s2982_s30 }
 0x8ff   : > { %p2372_p6 = pnand %p2371_p10, %p3180_p3 }
 0x900   : > { %p2377_p1 = por %p2376_p7, %p2375_p4 }
 0x901   : > { %p2373_p0 = pneg %p2372_p6 }
 0x902   : > { %p2379_p9 = por %p2378_p13, %p2377_p1 }
 0x904   : > { %p2380_p11 = pnand %p2379_p9, %p2373_p0 }
 0x906   : > { %2383 = shalt.err (!%p2380_p11)
}
 0x907   : > { %2144 = dma.vmem_to_hbm [thread:$0]  (%p3180_p3), %s1702_s20, 128, %s2982_s30, %s1675_s11  }
 0x908   : > { %s1679_s0 = sand.u32 1, %s2667_s28   ;;  %s514_s16 = scalar_lea.vmem [#allocation9], %s2940_s18 }
 0x909   : > { %s1718_s13 = sshll.u32 %s514_s16, 4  ;;  %s3181_s23 = scalar_lea.vmem [#allocation11], %s2940_s18  ;;  %s3013_s13 = int_to_ptr.vmem [resolvable:$true] %s1718_s13 }
 0x90a   : > { %s1734_s24 = sshll.u32 %s3181_s23, 4  ;;  %s3182_s8 = sld [smem:[#allocation30_spill]]  ;;  %s3021_s24 = int_to_ptr.vmem [resolvable:$true] %s1734_s24 }
 0x90b   : > { %s3183_s2 = sld [smem:[#allocation31_spill]]  ;;  %s3024_s28 = scalar_lea.sflag [#allocation10], %s1679_s0 }
 0x90c   : > { %s2384_s18 = scalar_lea.vmem %s3013_s13, 128  ;;  %s2551_s30 = smov [#allocation9]  }
 0x90d   : > { %p2385_p5 = scmp.ne.s32.totalorder %s3013_s13, %s2384_s18  ;;  %s2388_s20 = sshll.u32 %s2551_s30, 4  ;;  %s2389_s20 = int_to_ptr.vmem [resolvable:$false] %s2388_s20 }
 0x90e   : > { %s2390_s23 = scalar_lea.vmem %s2389_s20, 256  ;;  %p2391_p2 = scmp.lt.s32.totalorder %s3013_s13, %s2389_s20 }
 0x90f   : > { %p2386_p8 = pnand %p2385_p5, %p3180_p3  ;;  %p2392_p10 = scmp.lt.s32.totalorder %s2390_s23, %s2384_s18 }
 0x910   : > { %s3011_s1 = scalar_lea.hbm %s3182_s8, %s2976_s14 }
 0x911   : > { %s3019_s11 = scalar_lea.hbm %s3183_s2, %s2976_s14  ;;  %p2387_p12 = pneg %p2386_p8 }
 0x912   : > { %p2393_p6 = por %p2392_p10, %p2391_p2 }
 0x914   : > { %p2394_p0 = pnand %p2393_p6, %p2387_p12 }
 0x9cd   : > { %v1669_v63 = vpop.f32.mrb[12].mxu1 }
 0x9ce   : > { %1673 = vst.msk [vmem:[%s514_s16] sm:$0xff] %vm541_vm1, %v1669_v63  ;;  %v2112_v0 = vpop.f32.mrb[13].mxu1 }
 0x9cf   : > { %2397 = shalt.err (!%p2394_p0)
}
 0x9d0   : > { %s2398_s14 = scalar_lea.hbm %s3011_s1, 128  ;;  %s2402_s6 = scalar_lea.hbm %s3182_s8, 512 }
 0x9d1   : > { %p2399_p4 = scmp.ne.s32.totalorder %s3011_s1, %s2398_s14  ;;  %p2403_p13 = scmp.lt.u32.totalorder %s3011_s1, %s3182_s8 }
 0x9d2   : > { %p2404_p9 = scmp.lt.u32.totalorder %s2402_s6, %s2398_s14  ;;  %p2406_p5 = scmp.lt.u32.totalorder %s2398_s14, %s3011_s1 }
 0x9d3   : > { %p2400_p7 = pnand %p2399_p4, %p3180_p3 }
 0x9d4   : > { %p2405_p11 = por %p2404_p9, %p2403_p13 }
 0x9d5   : > { %p2401_p1 = pneg %p2400_p7 }
 0x9d6   : > { %p2407_p8 = por %p2406_p5, %p2405_p11 }
 0x9d8   : > { %p2408_p12 = pnand %p2407_p8, %p2401_p1 }
 0x9da   : > { %2411 = shalt.err (!%p2408_p12)
}
 0x9db   : > { %2145 = dma.vmem_to_hbm [thread:$0]  (%p3180_p3), %s3013_s13, 128, %s3011_s1, %s3024_s28  }
 0x9dc   : > { %s2412_s15 = scalar_lea.vmem %s3021_s24, 128  ;;  %s2552_s18 = smov [#allocation11]  }
 0x9dd   : > { %p2413_p2 = scmp.ne.s32.totalorder %s3021_s24, %s2412_s15  ;;  %s2416_s30 = sshll.u32 %s2552_s18, 4  ;;  %s2417_s30 = int_to_ptr.vmem [resolvable:$false] %s2416_s30 }
 0x9de   : > { %s2418_s20 = scalar_lea.vmem %s2417_s30, 256  ;;  %p2419_p0 = scmp.lt.s32.totalorder %s3021_s24, %s2417_s30 }
 0x9df   : > { %p2414_p10 = pnand %p2413_p2, %p3180_p3  ;;  %p2420_p4 = scmp.lt.s32.totalorder %s2418_s20, %s2412_s15 }
 0x9e1   : > { %p2415_p6 = pneg %p2414_p10  ;;  %p2421_p7 = por %p2420_p4, %p2419_p0 }
 0x9e3   : > { %p2422_p1 = pnand %p2421_p7, %p2415_p6 }
 0x9e5   : > { %2425 = shalt.err (!%p2422_p1)
}
 0x9e6   : > { %s2426_s13 = scalar_lea.hbm %s3019_s11, 128  ;;  %s2430_s14 = scalar_lea.hbm %s3183_s2, 512 }
 0x9e7   : > { %p2427_p13 = scmp.ne.s32.totalorder %s3019_s11, %s2426_s13  ;;  %p2431_p5 = scmp.lt.u32.totalorder %s3019_s11, %s3183_s2 }
 0x9e8   : > { %p2432_p8 = scmp.lt.u32.totalorder %s2430_s14, %s2426_s13  ;;  %p2434_p2 = scmp.lt.u32.totalorder %s2426_s13, %s3019_s11 }
 0x9e9   : > { %p2428_p9 = pnand %p2427_p13, %p3180_p3 }
 0x9ea   : > { %p2433_p12 = por %p2432_p8, %p2431_p5 }
 0x9eb   : > { %p2429_p11 = pneg %p2428_p9 }
 0x9ec   : > { %p2435_p10 = por %p2434_p2, %p2433_p12 }
 0x9ee   : > { %p2436_p6 = pnand %p2435_p10, %p2429_p11 }
 0x9f0   : > { %2439 = shalt.err (!%p2436_p6)
}
 0x9f1   : > { %2146 = dma.vmem_to_hbm [thread:$0]  (%p3180_p3), %s3021_s24, 128, %s3019_s11, %s3024_s28  }
 0x9f2 PF: > { %s3184_s6 = sld [smem:[#allocation16_spill]]  ;;  %s3185_s9 = sld [smem:[#allocation20_spill]] }
 0x9f3   : > { %p2176_p0 = scmp.ge.s32.totalorder %s2542_s27, 2 }
 0x9f8   : > { %s1746_s5 = sand.u32 1, %s3184_s6   ;;  %p3186_p4 = scmp.ne.s32.totalorder %s3185_s9, 0 }
 0x9f9   : > { %s1747_s15 = scalar_lea.sflag [#allocation4], %s1746_s5 }
 0x9fa   : > { %p2162_p7 = pnand %p2176_p0, %p3186_p4 }
 0x9fc   : > { %2493 = dma.done.wait (!%p2162_p7), %s1747_s15, 128  }
 0x9fd   : > { %2495 = vsyncadd (!%p2162_p7), %s1747_s15, 4294967168  ;;  %s3187_s18 = sadd.s32 4294967294, %s2542_s27  }
 0x9fe   : > { %s1755_s30 = sand.u32 1, %s3187_s18  }
 0x9ff   : > { %s1756_s20 = scalar_lea.sflag [#allocation10], %s1755_s30 }
 0xa00   : > { %2497 = dma.done.wait (!%p2162_p7), %s1756_s20, 256  }
 0xa01   : > { %2499 = vsyncadd (!%p2162_p7), %s1756_s20, 4294967040  ;;  %s32_s27 = sadd.s32 1, %s2542_s27   ;;  %s3188_s17 = sld [smem:[#allocation17_spill]] }
 0xa02   : > { %p29_p3 = scmp.ge.s32.totalorder %s32_s27, 6   ;;  %s3189_s23 = sld [smem:[#allocation18_spill]] }
 0xa03   : > { %s3190_s11 = sld [smem:[#allocation21_spill]]  ;;  %s3191_s18 = smov %s2510_s19 }
 0xa04   : > { %s3192_s19 = smov %s2790_s25  ;;  %s3193_s20 = smov %s2518_s21 }
 0xa05   : > { %s3194_s21 = smov %s2522_s22  ;;  %s3195_s22 = smov %s2785_s7 }
 0xa06   : > { %s3196_s24 = smov %s2538_s26  ;;  %s3198_s26 = smov %s3204_s10 }
 0xa07   :  { %31 = sbr.rel (!%p29_p3) target bundleno = 23 (0x17), region = 147 }
 0xa09   : > { %s3197_s25 = smov %s3190_s11 }
 0xa0e   :  { %1770 = vsyncpa [#allocation3], 1 }
 0xa0f   :  { %1772 = vsyncpa [#allocation3 + $0x1], 1 }
 0xa10   :  { %1773 = vsyncpa [#allocation6], 1 }
 0xa11   :  { %1774 = vsyncpa [#allocation4], 1 }
 0xa12   :  { %1776 = vsyncpa [#allocation4 + $0x1], 1 }
 0xa13   :  { %1777 = vsyncpa [#allocation10], 1 }
 0xa14   :  { %1779 = vsyncpa [#allocation10 + $0x1], 1 }

</bundles_post_ra>
